<compile_context>
chip_gen: v6e
topology: v6e:2x2x1
jax: 0.10.0
libtpu: 0.0.40
codegen_flags: <defaults>
</compile_context>

<pallas_src>
import functools
import math

import jax
import jax.numpy as jnp
from jax.experimental import pallas as pl
from jax.experimental.pallas import tpu as pltpu


def _round_up(x: int, m: int) -> int:
    return ((x + m - 1) // m) * m


def _cdiv(a: int, b: int) -> int:
    return (a + b - 1) // b


def _device_kind() -> str:
    try:
        return jax.devices()[0].device_kind.lower()
    except Exception:
        return ""


def _is_two_core(kind: str) -> bool:
    return ("v7" in kind) or ("7x" in kind)


def _vmem_budget_bytes() -> int:
    """Per-generation scoped-VMEM budget (leaves headroom for compiler scratch)."""
    kind = _device_kind()
    cap = None
    try:
        cap = int(pltpu.get_tpu_info().vmem_capacity_bytes)
    except Exception:
        cap = None
    if cap is None:
        if _is_two_core(kind):
            cap = 64 << 20
        elif ("v2" in kind) or ("v3" in kind):
            cap = 16 << 20
        else:
            cap = 128 << 20
    if _is_two_core(kind):
        cap = min(cap, 64 << 20)
        return max(cap - (8 << 20), 32 << 20)          # ~56 MiB on v7x
    return max(min(cap, 128 << 20) - (28 << 20), 16 << 20)  # ~100 MiB on v5e/v6e


# ----------------------------------------------------------------------------
# Kernel: one grid step pushes a (tile_b, K0) batch tile through a group of
# `num_layers` linear layers. Weights are VMEM-resident (constant block).
# ----------------------------------------------------------------------------
def _fused_galu_group_kernel(*refs, num_layers: int, activate_last: bool,
                             emit_pre: bool):
    # refs: [x] + [w0,b0, ..., w_{L-1},b_{L-1}] + outputs
    # outputs (in order): for each GALU'd layer i: (pre_i if emit_pre);
    #   then carry (bf16 activation) if the group's last layer is GALU'd,
    #   else the final linear output (f32).
    x_ref = refs[0]
    p_refs = refs[1:1 + 2 * num_layers]
    out_refs = refs[1 + 2 * num_layers:]
    n_galu = num_layers if activate_last else num_layers - 1

    # Cast to bf16 inside the kernel (input arrives as f32/bf16 straight from HBM).
    act = x_ref[...].astype(jnp.bfloat16)
    oi = 0
    for i in range(num_layers):
        w = p_refs[2 * i][...]                         # bf16 (K, Np)
        b = p_refs[2 * i + 1][...]                     # f32  (1, Np)
        pre = jnp.dot(act, w, preferred_element_type=jnp.float32) + b
        if i < n_galu:
            if emit_pre:
                out_refs[oi][...] = pre.astype(out_refs[oi].dtype)
                oi += 1
            # GALU / SiLU: x * sigmoid(x). exp -> EUP, approx reciprocal -> EUP
            # (keeps the divide off the VPU); f32 math is safe on all chips.
            sig = pl.reciprocal(1.0 + jnp.exp(-pre), approx=True)
            act = (pre * sig).astype(jnp.bfloat16)
            if i == num_layers - 1:                    # carry to next group
                out_refs[oi][...] = act
                oi += 1
        else:                                          # network output layer
            out_refs[oi][...] = pre.astype(out_refs[oi].dtype)
            oi += 1


def _pick_tile_b(B: int, K0: int, group_dims, *, activate_last: bool,
                 emit_pre: bool, layer_out_bytes: int, budget: int,
                 two_core: bool) -> int:
    """Largest batch tile (multiple of 16) that fits the VMEM budget."""
    num_layers = len(group_dims)
    n_galu = num_layers if activate_last else num_layers - 1
    # Resident params: W bf16 + b f32, single-buffered (Buffered(1)).
    param_bytes = sum(kp * np_ * 2 + np_ * 4 for kp, np_ in group_dims)
    # Per-batch-row VMEM: x tile (double-buffered) + output tiles
    # (double-buffered) + headroom for the in-kernel f32 pre/act temporaries.
    per_row = 2 * K0 * 4
    for i, (_, np_) in enumerate(group_dims):
        if i < n_galu:
            if emit_pre:
                per_row += 2 * np_ * layer_out_bytes
            if i == num_layers - 1:
                per_row += 2 * np_ * 2                 # bf16 carry
        else:
            per_row += 2 * np_ * 4                     # f32 logits
        per_row += 2 * np_ * 4                         # f32 temporaries headroom
    avail = max(budget - param_bytes - (2 << 20), per_row * 16)
    tile_b = max(16, (avail // per_row) // 16 * 16)
    tile_b = min(tile_b, 512)
    if two_core and B >= 32:
        # >=2 grid steps so dimension_semantics=("parallel",) spans both TCs.
        tile_b = min(tile_b, _round_up(_cdiv(B, 2), 16))
    tile_b = min(tile_b, _round_up(B, 16))
    # Rebalance so padded rows are minimal for the chosen step count.
    n_tiles = _cdiv(B, tile_b)
    tile_b = min(tile_b, _round_up(_cdiv(B, n_tiles), 16))
    return max(16, tile_b)


def _fused_galu_group(x, group_params, *, activate_last: bool, emit_pre: bool,
                      layer_out_dtype, tile_b: int, vmem_limit_bytes: int):
    """Run one group of layers in a single pallas_call. x: (B, K0) f32 or bf16."""
    B, K0 = x.shape
    num_layers = len(group_params)
    n_galu = num_layers if activate_last else num_layers - 1

    n_tiles = _cdiv(B, tile_b)
    Bp = n_tiles * tile_b
    if Bp != B:
        # Batch-only zero pad (no dtype conversion); hit only for odd batches.
        x = jnp.pad(x, ((0, Bp - B), (0, 0)))

    in_specs = [pl.BlockSpec((tile_b, K0), lambda g: (g, 0))]
    flat = [x]
    for (w, b) in group_params:
        kp, np_ = w.shape
        # Constant blocks (index_map -> (0,0)): keep them SINGLE-buffered so
        # resident weights/biases do not cost 2x VMEM.
        in_specs.append(pl.BlockSpec((kp, np_), lambda g: (0, 0),
                                     pipeline_mode=pl.Buffered(1)))
        in_specs.append(pl.BlockSpec((1, np_), lambda g: (0, 0),
                                     pipeline_mode=pl.Buffered(1)))
        flat.append(w)
        flat.append(b)

    out_shapes = []
    out_specs = []
    for i, (w, _) in enumerate(group_params):
        np_ = w.shape[1]                     # multiple of 128 -> lane-dense vst
        if i < n_galu:
            if emit_pre:
                out_shapes.append(jax.ShapeDtypeStruct((Bp, np_), layer_out_dtype))
                out_specs.append(pl.BlockSpec((tile_b, np_), lambda g: (g, 0)))
            if i == num_layers - 1:
                out_shapes.append(jax.ShapeDtypeStruct((Bp, np_), jnp.bfloat16))
                out_specs.append(pl.BlockSpec((tile_b, np_), lambda g: (g, 0)))
        else:
            out_shapes.append(jax.ShapeDtypeStruct((Bp, np_), jnp.float32))
            out_specs.append(pl.BlockSpec((tile_b, np_), lambda g: (g, 0)))

    flops = 2 * Bp * sum(w.shape[0] * w.shape[1] for w, _ in group_params)
    transcendentals = Bp * sum(group_params[i][0].shape[1] for i in range(n_galu))
    bytes_accessed = (
        int(x.size) * x.dtype.itemsize
        + sum(int(w.size) * w.dtype.itemsize + int(b.size) * b.dtype.itemsize
              for w, b in group_params)
        + sum(math.prod(s.shape) * jnp.dtype(s.dtype).itemsize for s in out_shapes))

    kernel = functools.partial(_fused_galu_group_kernel,
                               num_layers=num_layers,
                               activate_last=activate_last,
                               emit_pre=emit_pre)
    outs = pl.pallas_call(
        kernel,
        out_shape=tuple(out_shapes),
        grid_spec=pltpu.PrefetchScalarGridSpec(
            num_scalar_prefetch=0,
            grid=(n_tiles,),
            in_specs=in_specs,
            out_specs=out_specs,
        ),
        compiler_params=pltpu.CompilerParams(
            dimension_semantics=("parallel",),          # batch tiles independent
            vmem_limit_bytes=int(vmem_limit_bytes),     # raise scoped VMEM limit
        ),
        cost_estimate=pl.CostEstimate(
            flops=int(flops),
            transcendentals=int(transcendentals),
            bytes_accessed=int(bytes_accessed)),
    )(*flat)
    if not isinstance(outs, (tuple, list)):
        outs = (outs,)
    return tuple(outs)


def _forward_impl(params, x_flat, *, group_sizes, group_tile_bs, group_vmem,
                  emit_pre, layer_out_dtype, nodes, num_classes):
    B = x_flat.shape[0]
    layer_outs = []
    act = x_flat
    start = 0
    n_groups = len(group_sizes)
    for gi, gsz in enumerate(group_sizes):
        gparams = params[start:start + gsz]
        start += gsz
        last_group = gi == n_groups - 1
        outs = _fused_galu_group(
            act, gparams,
            activate_last=not last_group,
            emit_pre=emit_pre,
            layer_out_dtype=layer_out_dtype,
            tile_b=group_tile_bs[gi],
            vmem_limit_bytes=group_vmem[gi])
        n_galu = gsz if not last_group else gsz - 1
        if emit_pre:
            layer_outs.extend(outs[:n_galu])
        act = outs[-1]                      # bf16 carry or final f32 logits
    final = act[:B, :num_classes]
    layer_outs = [lo[:B, :nodes[i]] for i, lo in enumerate(layer_outs)]
    return final, layer_outs


# ----------------------------------------------------------------------------
# GALU_DNN_FC_Network equivalent (no PCA layer attached — in torch it is only
# active after an explicit initialize_PCA_transformation call).
# ----------------------------------------------------------------------------
class GALUDNNFCNetworkPallas:
    def __init__(self, nodes_in_each_layer_list, input_size_list=(28, 28),
                 seed=2022, num_classes=10, store_layer_outs=True,
                 layer_out_dtype=jnp.bfloat16):
        self.nodes_in_each_layer_list = list(nodes_in_each_layer_list)
        self.input_size_list = list(input_size_list)
        self.num_classes = num_classes
        self._store_layer_outs = store_layer_outs
        self._layer_out_dtype = layer_out_dtype

        in_features = 1
        for d in self.input_size_list:
            in_features *= d
        self.in_features = in_features

        layer_sizes = self.nodes_in_each_layer_list + [num_classes]

        # Deterministic parameter init mirroring nn.Linear's default
        # U(-1/sqrt(fan_in), 1/sqrt(fan_in)) scheme (not a checkpoint load).
        # TODO(synk): torch.manual_seed RNG stream cannot be reproduced in JAX.
        # Weights stored TRANSPOSED (in, out), bf16, output dim padded to 128;
        # layer-0 keeps its true K so the raw flattened input feeds it directly.
        key = jax.random.PRNGKey(seed)
        self.true_dims = []   # (K, N) per layer, unpadded
        self.params = []      # (W bf16 (Kp, Np), b f32 (1, Np)), zero-padded
        prev = in_features
        for li, out in enumerate(layer_sizes):
            key, kw, kb = jax.random.split(key, 3)
            bound = 1.0 / math.sqrt(prev)
            w = jax.random.uniform(kw, (prev, out), jnp.float32, -bound, bound)
            b = jax.random.uniform(kb, (out,), jnp.float32, -bound, bound)
            kp = prev if li == 0 else _round_up(prev, 128)
            np_ = _round_up(out, 128)
            w_pad = jnp.zeros((kp, np_), jnp.bfloat16).at[:prev, :out].set(
                w.astype(jnp.bfloat16))
            b_pad = jnp.zeros((1, np_), jnp.float32).at[0, :out].set(b)
            self.true_dims.append((prev, out))
            self.params.append((w_pad, b_pad))
            prev = out

        kind = _device_kind()
        self._two_core = _is_two_core(kind)
        self._vmem_budget = _vmem_budget_bytes()

        # Split into layer groups if padded weights outgrow ~60% of the budget.
        threshold = int(0.6 * self._vmem_budget)
        group_sizes = []
        cur, cur_bytes = 0, 0
        for (w, b) in self.params:
            pb = int(w.size) * 2 + int(b.size) * 4
            if cur and cur_bytes + pb > threshold:
                group_sizes.append(cur)
                cur, cur_bytes = 0, 0
            cur += 1
            cur_bytes += pb
        if cur:
            group_sizes.append(cur)
        self._group_sizes = tuple(group_sizes)

        self._jit_cache = {}   # keyed by batch size (tile plan is per-B)

        # TODO(synk): PCA_Layer / initialize_PCA_transformation (sklearn PCA fit
        # at init) is data-dependent preprocessing; not implemented here.

    def _build_plan(self, B: int):
        layer_out_bytes = jnp.dtype(self._layer_out_dtype).itemsize
        tile_bs = []
        start = 0
        k_in = self.in_features
        n_groups = len(self._group_sizes)
        for gi, gsz in enumerate(self._group_sizes):
            gdims = [(w.shape[0], w.shape[1])
                     for w, _ in self.params[start:start + gsz]]
            start += gsz
            last_group = gi == n_groups - 1
            tb = _pick_tile_b(B, k_in, gdims,
                              activate_last=not last_group,
                              emit_pre=self._store_layer_outs,
                              layer_out_bytes=layer_out_bytes,
                              budget=self._vmem_budget,
                              two_core=self._two_core)
            tile_bs.append(tb)
            k_in = gdims[-1][1]              # padded carry width feeds next group
        return tuple(tile_bs)

    def _get_forward(self, B: int):
        fn = self._jit_cache.get(B)
        if fn is None:
            tile_bs = self._build_plan(B)
            fn = jax.jit(functools.partial(
                _forward_impl,
                group_sizes=self._group_sizes,
                group_tile_bs=tile_bs,
                group_vmem=tuple([self._vmem_budget] * len(self._group_sizes)),
                emit_pre=self._store_layer_outs,
                layer_out_dtype=self._layer_out_dtype,
                nodes=tuple(self.nodes_in_each_layer_list),
                num_classes=self.num_classes))
            self._jit_cache[B] = fn
        return fn

    def __call__(self, inp: jax.Array) -> jax.Array:
        # torch.flatten(inp, 1)
        x = inp.reshape(inp.shape[0], -1).astype(jnp.float32)
        fwd = self._get_forward(x.shape[0])
        out, layer_outs = fwd(self.params, x)
        self.linear_conv_outputs = layer_outs   # pre-activation (bf16 by default)
        self.prev_out = out
        return out                              # (B, num_classes) f32


# Pure-JAX reference mirroring the kernel's math (bf16 weights/activations,
# f32 accumulate) for the correctness check.
def _reference_forward(params, true_dims, x_flat):
    act = x_flat.astype(jnp.bfloat16).astype(jnp.float32)
    num_hidden = len(params) - 1
    for i in range(num_hidden):
        K, N = true_dims[i]
        w, b = params[i]
        pre = act @ w[:K, :N].astype(jnp.float32) + b[0, :N]
        sig = 1.0 / (1.0 + jnp.exp(-pre))
        act = (pre * sig).astype(jnp.bfloat16).astype(jnp.float32)
    K, N = true_dims[-1]
    w, b = params[-1]
    return act @ w[:K, :N].astype(jnp.float32) + b[0, :N]


if __name__ == "__main__":
    # Small, module-consistent shapes: batch=8, input_size_list=[16, 16],
    # two hidden layers, 10 classes.
    batch = 8
    input_size_list = [16, 16]
    nodes = [64, 32]
    num_classes = 10

    net = GALUDNNFCNetworkPallas(nodes, input_size_list, seed=2022,
                                 num_classes=num_classes)

    key = jax.random.PRNGKey(0)
    x = jax.random.normal(key, (batch, *input_size_list), dtype=jnp.float32)

    out = net(x)
    out = jax.block_until_ready(out)

    ref = _reference_forward(net.params, net.true_dims,
                             x.reshape(batch, -1).astype(jnp.float32))
    assert out.shape == (batch, num_classes), out.shape
    # Kernel uses approx-reciprocal sigmoid + bf16 activations; tolerance
    # accounts for that vs. the exact-sigmoid bf16 reference.
    assert jnp.allclose(out, ref, atol=3e-2, rtol=3e-2), \
        float(jnp.max(jnp.abs(out - ref)))
    assert [tuple(o.shape) for o in net.linear_conv_outputs] == \
        [(batch, nodes[0]), (batch, nodes[1])]

    print("KERNEL_OK")
</pallas_src>

<mosaic_0001>
module attributes {stable_mosaic.version = 11 : i64} {
  func.func @_fused_galu_group_kernel(%arg0: i32, %arg1: memref<16x256xf32, #tpu.memory_space<vmem>>, %arg2: memref<256x128xbf16, #tpu.memory_space<vmem>>, %arg3: memref<1x128xf32, #tpu.memory_space<vmem>>, %arg4: memref<128x128xbf16, #tpu.memory_space<vmem>>, %arg5: memref<1x128xf32, #tpu.memory_space<vmem>>, %arg6: memref<128x128xbf16, #tpu.memory_space<vmem>>, %arg7: memref<1x128xf32, #tpu.memory_space<vmem>>, %arg8: memref<16x128xbf16, #tpu.memory_space<vmem>>, %arg9: memref<16x128xbf16, #tpu.memory_space<vmem>>, %arg10: memref<16x128xf32, #tpu.memory_space<vmem>>) attributes {dimension_semantics = [#tpu.dimension_semantics<parallel>], iteration_bounds = array<i64: 1>, scalar_prefetch = 0 : i64, scratch_operands = 0 : i64, tpu.core_type = #tpu.core_type<tc>, window_params = [{transform_indices = @transform_0, window_bounds = array<i64: 16, 256>}, {pipeline_mode = #tpu.pipeline_mode<synchronous>, transform_indices = @transform_1, window_bounds = array<i64: 256, 128>}, {pipeline_mode = #tpu.pipeline_mode<synchronous>, transform_indices = @transform_2, window_bounds = array<i64: 1, 128>}, {pipeline_mode = #tpu.pipeline_mode<synchronous>, transform_indices = @transform_3, window_bounds = array<i64: 128, 128>}, {pipeline_mode = #tpu.pipeline_mode<synchronous>, transform_indices = @transform_4, window_bounds = array<i64: 1, 128>}, {pipeline_mode = #tpu.pipeline_mode<synchronous>, transform_indices = @transform_5, window_bounds = array<i64: 128, 128>}, {pipeline_mode = #tpu.pipeline_mode<synchronous>, transform_indices = @transform_6, window_bounds = array<i64: 1, 128>}, {transform_indices = @transform_7, window_bounds = array<i64: 16, 128>}, {transform_indices = @transform_8, window_bounds = array<i64: 16, 128>}, {transform_indices = @transform_9, window_bounds = array<i64: 16, 128>}]} {
    %c0 = arith.constant 0 : index
    %c0_0 = arith.constant 0 : index
    %0 = vector.load %arg1[%c0, %c0_0] : memref<16x256xf32, #tpu.memory_space<vmem>>, vector<16x256xf32>
    %1 = arith.truncf %0 : vector<16x256xf32> to vector<16x256xbf16>
    %c0_1 = arith.constant 0 : index
    %c0_2 = arith.constant 0 : index
    %2 = vector.load %arg2[%c0_1, %c0_2] : memref<256x128xbf16, #tpu.memory_space<vmem>>, vector<256x128xbf16>
    %c0_3 = arith.constant 0 : index
    %c0_4 = arith.constant 0 : index
    %3 = vector.load %arg3[%c0_3, %c0_4] : memref<1x128xf32, #tpu.memory_space<vmem>>, vector<1x128xf32>
    %cst = arith.constant dense<0.000000e+00> : vector<16x128xf32>
    %4 = tpu.matmul %1, %2, %cst {dimension_numbers = #tpu.dot_dimension_numbers<[1], [0], [0], [1], [0, 0, 1, 1], [], []>} : vector<16x256xbf16>, vector<256x128xbf16>, vector<16x128xf32> -> vector<16x128xf32>
    %5 = vector.broadcast %3 : vector<1x128xf32> to vector<16x128xf32>
    %6 = arith.addf %4, %5 : vector<16x128xf32>
    %7 = arith.truncf %6 : vector<16x128xf32> to vector<16x128xbf16>
    %c0_5 = arith.constant 0 : index
    %c0_6 = arith.constant 0 : index
    %8 = vector.load %arg8[%c0_5, %c0_6] : memref<16x128xbf16, #tpu.memory_space<vmem>>, vector<16x128xbf16>
    tpu.vector_store %arg8[%c0_5, %c0_6], %7 {strides = array<i32>} : memref<16x128xbf16, #tpu.memory_space<vmem>>, vector<16x128xbf16>,
    %cst_7 = arith.constant 0.000000e+00 : f32
    %9 = vector.broadcast %cst_7 : f32 to vector<16x128xf32>
    %10 = arith.subf %9, %6 : vector<16x128xf32>
    %11 = math.exp %10 : vector<16x128xf32>
    %cst_8 = arith.constant 1.000000e+00 : f32
    %12 = vector.broadcast %cst_8 : f32 to vector<16x128xf32>
    %13 = arith.addf %12, %11 : vector<16x128xf32>
    %14 = tpu.reciprocal %13 {approx = true} : vector<16x128xf32> -> vector<16x128xf32>
    %15 = arith.mulf %6, %14 : vector<16x128xf32>
    %16 = arith.truncf %15 : vector<16x128xf32> to vector<16x128xbf16>
    %c0_9 = arith.constant 0 : index
    %c0_10 = arith.constant 0 : index
    %17 = vector.load %arg4[%c0_9, %c0_10] : memref<128x128xbf16, #tpu.memory_space<vmem>>, vector<128x128xbf16>
    %c0_11 = arith.constant 0 : index
    %c0_12 = arith.constant 0 : index
    %18 = vector.load %arg5[%c0_11, %c0_12] : memref<1x128xf32, #tpu.memory_space<vmem>>, vector<1x128xf32>
    %cst_13 = arith.constant dense<0.000000e+00> : vector<16x128xf32>
    %19 = tpu.matmul %16, %17, %cst_13 {dimension_numbers = #tpu.dot_dimension_numbers<[1], [0], [0], [1], [0, 0, 1, 1], [], []>} : vector<16x128xbf16>, vector<128x128xbf16>, vector<16x128xf32> -> vector<16x128xf32>
    %20 = vector.broadcast %18 : vector<1x128xf32> to vector<16x128xf32>
    %21 = arith.addf %19, %20 : vector<16x128xf32>
    %22 = arith.truncf %21 : vector<16x128xf32> to vector<16x128xbf16>
    %c0_14 = arith.constant 0 : index
    %c0_15 = arith.constant 0 : index
    %23 = vector.load %arg9[%c0_14, %c0_15] : memref<16x128xbf16, #tpu.memory_space<vmem>>, vector<16x128xbf16>
    tpu.vector_store %arg9[%c0_14, %c0_15], %22 {strides = array<i32>} : memref<16x128xbf16, #tpu.memory_space<vmem>>, vector<16x128xbf16>,
    %cst_16 = arith.constant 0.000000e+00 : f32
    %24 = vector.broadcast %cst_16 : f32 to vector<16x128xf32>
    %25 = arith.subf %24, %21 : vector<16x128xf32>
    %26 = math.exp %25 : vector<16x128xf32>
    %cst_17 = arith.constant 1.000000e+00 : f32
    %27 = vector.broadcast %cst_17 : f32 to vector<16x128xf32>
    %28 = arith.addf %27, %26 : vector<16x128xf32>
    %29 = tpu.reciprocal %28 {approx = true} : vector<16x128xf32> -> vector<16x128xf32>
    %30 = arith.mulf %21, %29 : vector<16x128xf32>
    %31 = arith.truncf %30 : vector<16x128xf32> to vector<16x128xbf16>
    %c0_18 = arith.constant 0 : index
    %c0_19 = arith.constant 0 : index
    %32 = vector.load %arg6[%c0_18, %c0_19] : memref<128x128xbf16, #tpu.memory_space<vmem>>, vector<128x128xbf16>
    %c0_20 = arith.constant 0 : index
    %c0_21 = arith.constant 0 : index
    %33 = vector.load %arg7[%c0_20, %c0_21] : memref<1x128xf32, #tpu.memory_space<vmem>>, vector<1x128xf32>
    %cst_22 = arith.constant dense<0.000000e+00> : vector<16x128xf32>
    %34 = tpu.matmul %31, %32, %cst_22 {dimension_numbers = #tpu.dot_dimension_numbers<[1], [0], [0], [1], [0, 0, 1, 1], [], []>} : vector<16x128xbf16>, vector<128x128xbf16>, vector<16x128xf32> -> vector<16x128xf32>
    %35 = vector.broadcast %33 : vector<1x128xf32> to vector<16x128xf32>
    %36 = arith.addf %34, %35 : vector<16x128xf32>
    %c0_23 = arith.constant 0 : index
    %c0_24 = arith.constant 0 : index
    %37 = vector.load %arg10[%c0_23, %c0_24] : memref<16x128xf32, #tpu.memory_space<vmem>>, vector<16x128xf32>
    tpu.vector_store %arg10[%c0_23, %c0_24], %36 {strides = array<i32>} : memref<16x128xf32, #tpu.memory_space<vmem>>, vector<16x128xf32>,
    return
  }
  func.func @transform_0(%arg0: i32) -> (i32, i32) {
    %c0_i32 = arith.constant 0 : i32
    %c0_i32_0 = arith.constant 0 : i32
    return %arg0, %c0_i32 : i32, i32
  }
  func.func @transform_1(%arg0: i32) -> (i32, i32) {
    %c0_i32 = arith.constant 0 : i32
    %c0_i32_0 = arith.constant 0 : i32
    %c0_i32_1 = arith.constant 0 : i32
    return %c0_i32, %c0_i32_0 : i32, i32
  }
  func.func @transform_2(%arg0: i32) -> (i32, i32) {
    %c0_i32 = arith.constant 0 : i32
    %c0_i32_0 = arith.constant 0 : i32
    %c0_i32_1 = arith.constant 0 : i32
    return %c0_i32, %c0_i32_0 : i32, i32
  }
  func.func @transform_3(%arg0: i32) -> (i32, i32) {
    %c0_i32 = arith.constant 0 : i32
    %c0_i32_0 = arith.constant 0 : i32
    %c0_i32_1 = arith.constant 0 : i32
    return %c0_i32, %c0_i32_0 : i32, i32
  }
  func.func @transform_4(%arg0: i32) -> (i32, i32) {
    %c0_i32 = arith.constant 0 : i32
    %c0_i32_0 = arith.constant 0 : i32
    %c0_i32_1 = arith.constant 0 : i32
    return %c0_i32, %c0_i32_0 : i32, i32
  }
  func.func @transform_5(%arg0: i32) -> (i32, i32) {
    %c0_i32 = arith.constant 0 : i32
    %c0_i32_0 = arith.constant 0 : i32
    %c0_i32_1 = arith.constant 0 : i32
    return %c0_i32, %c0_i32_0 : i32, i32
  }
  func.func @transform_6(%arg0: i32) -> (i32, i32) {
    %c0_i32 = arith.constant 0 : i32
    %c0_i32_0 = arith.constant 0 : i32
    %c0_i32_1 = arith.constant 0 : i32
    return %c0_i32, %c0_i32_0 : i32, i32
  }
  func.func @transform_7(%arg0: i32) -> (i32, i32) {
    %c0_i32 = arith.constant 0 : i32
    %c0_i32_0 = arith.constant 0 : i32
    return %arg0, %c0_i32 : i32, i32
  }
  func.func @transform_8(%arg0: i32) -> (i32, i32) {
    %c0_i32 = arith.constant 0 : i32
    %c0_i32_0 = arith.constant 0 : i32
    return %arg0, %c0_i32 : i32, i32
  }
  func.func @transform_9(%arg0: i32) -> (i32, i32) {
    %c0_i32 = arith.constant 0 : i32
    %c0_i32_0 = arith.constant 0 : i32
    return %arg0, %c0_i32 : i32, i32
  }
}

</mosaic_0001>

<bundles_post_ra>
// kernel: _forward_impl.1
= control target key start
LH: loop header
LB: loop body
LE: loop exit
PB: predicated region body
PF: predicated region fallthrough
CT: control target
= control target key end

     0   :  { %15 = vsyncpa [#allocation3], 0  ;;  %s908_s0 = inlined_call_operand.vmem [shape: f32[16,256], index: 0, kind: input, shape index: {}]   ;;  %s909_s1 = inlined_call_operand.hbm [shape: bf16[256,128], index: 1, kind: input, shape index: {}]   ;;  %s910_s2 = inlined_call_operand.vmem [shape: f32[1,128], index: 2, kind: input, shape index: {}]   ;;  %s911_s3 = inlined_call_operand.hbm [shape: bf16[128,128], index: 3, kind: input, shape index: {}]   ;;  %s912_s4 = inlined_call_operand.vmem [shape: f32[1,128], index: 4, kind: input, shape index: {}]   ;;  %s913_s5 = inlined_call_operand.hbm [shape: bf16[128,128], index: 5, kind: input, shape index: {}]   ;;  %s914_s6 = inlined_call_operand.vmem [shape: f32[1,128], index: 6, kind: input, shape index: {}]   ;;  %s915_s7 = inlined_call_operand.vmem [shape: bf16[16,128], index: 7, kind: output, shape index: {0}]   ;;  %s916_s8 = inlined_call_operand.vmem [shape: bf16[16,128], index: 8, kind: output, shape index: {1}]   ;;  %s917_s9 = inlined_call_operand.vmem [shape: f32[16,128], index: 9, kind: output, shape index: {2}]  }
   0x1   :  { %16 = vsyncpa [#allocation5], 0  ;;  %s791_s30 = smov [#allocation4]   ;;  %s792_s11 = smov [#allocation2]  }
   0x2   :  { %s38_s10 = sshll.u32 %s791_s30, 4  ;;  %s24_s12 = sshll.u32 %s792_s11, 4  ;;  %s39_s10 = int_to_ptr.vmem [resolvable:$true] %s38_s10  ;;  %s25_s12 = int_to_ptr.vmem [resolvable:$true] %s24_s12 }
   0x3   :  { %s735_s13 = scalar_lea.vmem %s39_s10, 1024  ;;  %p740_p1 = scmp.lt.s32.totalorder %s39_s10, %s39_s10 }
   0x4   :  { %p736_p0 = scmp.ne.s32.totalorder %s39_s10, %s735_s13  ;;  %p741_p2 = scmp.lt.s32.totalorder %s735_s13, %s735_s13 }
   0x6   :  { %p742_p3 = por %p741_p2, %p740_p1 }
   0x8   :  { %p743_p4 = pnand %p742_p3, %p736_p0 }
   0xa   :  { %746 = shalt.err (!%p743_p4)
}
   0xb   :  { %s793_s14 = smov 64   ;;  %s794_s15 = smov 4  }
   0xc   :  { %44 = dma.hbm_to_vmem [thread:$0]  %s911_s3, 1024, %s39_s10, [#allocation5], %s793_s14, %s793_s14, %s794_s15  }
   0xd   :  { %s755_s18 = scalar_lea.vmem %s25_s12, 2048  ;;  %p760_p6 = scmp.lt.s32.totalorder %s25_s12, %s25_s12 }
   0xe   :  { %p756_p5 = scmp.ne.s32.totalorder %s25_s12, %s755_s18  ;;  %p761_p7 = scmp.lt.s32.totalorder %s755_s18, %s755_s18 }
  0x10   :  { %p762_p8 = por %p761_p7, %p760_p6 }
  0x12   :  { %p763_p9 = pnand %p762_p8, %p756_p5 }
  0x14   :  { %766 = shalt.err (!%p763_p9)
}
  0x15   :  { %30 = dma.hbm_to_vmem [thread:$0]  %s909_s1, 2048, %s25_s12, [#allocation3], %s793_s14, %s793_s14, %s794_s15  }
  0x16   :  { %s795_s21 = smov [#allocation6]  }
  0x17   :  { %s52_s22 = sshll.u32 %s795_s21, 4  ;;  %s53_s22 = int_to_ptr.vmem [resolvable:$true] %s52_s22 }
  0x18   :  { %s775_s23 = scalar_lea.vmem %s53_s22, 1024  ;;  %p780_p11 = scmp.lt.s32.totalorder %s53_s22, %s53_s22 }
  0x19   :  { %p776_p10 = scmp.ne.s32.totalorder %s53_s22, %s775_s23  ;;  %p781_p12 = scmp.lt.s32.totalorder %s775_s23, %s775_s23 }
  0x1b   :  { %p782_p13 = por %p781_p12, %p780_p11 }
  0x1d   :  { %p783_p0 = pnand %p782_p13, %p776_p10 }
  0x1f   :  { %786 = shalt.err (!%p783_p0)
}
  0x20   :  { %58 = dma.hbm_to_vmem [thread:$0]  %s913_s5, 1024, %s53_s22, [#allocation5], %s793_s14, %s793_s14, %s794_s15  }
  0x21   :  { %787 = dma.done.wait [#allocation3], 2048  }
  0x22   :  { %788 = vsyncadd [#allocation3], 4294965248 }
  0x23   :  { %789 = dma.done.wait [#allocation5], 2048  }
  0x24   :  { %790 = vsyncadd [#allocation5], 4294965248  ;;  %v679_v0 = vld [vmem:[#allocation2 + $0x78] sm:$0xff]   ;;  %v681_v2 = vld [vmem:[#allocation2 + $0x70] sm:$0xff]   ;;  %v796_v23 = vmov 0.0   ;;  %vm797_vm0 = vmmov 0  }
  0x25   :  { %v680_v1 = vld [vmem:[#allocation2 + $0x38] sm:$0xff]   ;;  %592 = vmatprep.subr.bf16.mxu0 %v679_v0  ;;  %v682_v3 = vld [vmem:[#allocation2 + $0x30] sm:$0xff]   ;;  %v683_v4 = vld [vmem:[#allocation2 + $0x68] sm:$0xff]   ;;  %632 = vmatprep.subr.bf16.mxu1 %v796_v23 }
  0x26   :  { %593 = vmatpush3.bf16.msra.mxu0 %v680_v1  ;;  %v684_v5 = vld [vmem:[#allocation2 + $0x28] sm:$0xff]   ;;  %v685_v6 = vld [vmem:[#allocation2 + $0x60] sm:$0xff]   ;;  %v687_v8 = vld [vmem:[#allocation2 + $0x58] sm:$0xff]   ;;  %648 = vmatprep.mubr.msk.bf16.mxu1 %vm797_vm0, %v796_v23 }
  0x27   :  { %594 = vmatprep.subr.bf16.mxu0 %v681_v2  ;;  %v686_v7 = vld [vmem:[#allocation2 + $0x20] sm:$0xff]   ;;  %v688_v9 = vld [vmem:[#allocation2 + $0x18] sm:$0xff]   ;;  %v689_v10 = vld [vmem:[#allocation2 + $0x50] sm:$0xff]  }
  0x28   :  { %v72_v11 = vld [vmem:[%s908_s0 + $0x8] sm:$0xff]  ;;  %v74_v12 = vld [vmem:[%s908_s0 + $0x18] sm:$0xff]  ;;  %v690_v13 = vld [vmem:[#allocation2 + $0x10] sm:$0xff]  }
  0x29   :  { %v76_v14 = vpack.c.bf16 %v74_v12, %v72_v11  ;;  %v691_v15 = vld [vmem:[#allocation2 + $0x48] sm:$0xff]   ;;  %v693_v17 = vld [vmem:[#allocation2 + $0x40] sm:$0xff]   ;;  %v73_v20 = vld [vmem:[%s908_s0 + $0x10] sm:$0xff] }
  0x2a   :  { %595 = vmatpush3.bf16.msra.mxu0 %v682_v3  ;;  %v692_v16 = vld [vmem:[#allocation2 + $0x8] sm:$0xff]   ;;  %v694_v18 = vld [vmem:[#allocation2] sm:$0xff]   ;;  %v695_v22 = vld [vmem:[#allocation4 + $0x38] sm:$0xff]  }
  0x2b   :  { %596 = vmatprep.subr.bf16.mxu0 %v683_v4  ;;  %244 = vmatprep.mubr.bf16.mxu0 %v76_v14  ;;  %v71_v19 = vld [vmem:[%s908_s0] sm:$0xff]  ;;  %v696_v24 = vld [vmem:[#allocation4 + $0x30] sm:$0xff]   ;;  %v697_v25 = vld [vmem:[#allocation4 + $0x28] sm:$0xff]  }
  0x2c   :  { %v75_v21 = vpack.c.bf16 %v73_v20, %v71_v19  ;;  %633 = vmatpush3.bf16.msra.mxu1 %v695_v22  ;;  %v698_v26 = vld [vmem:[#allocation4 + $0x20] sm:$0xff]   ;;  %v699_v27 = vld [vmem:[#allocation4 + $0x18] sm:$0xff]   ;;  %v700_v28 = vld [vmem:[#allocation4 + $0x10] sm:$0xff]  }
  0x2d   :  { %634 = vmatprep.subr.bf16.mxu1 %v796_v23  ;;  %v701_v29 = vld [vmem:[#allocation4 + $0x8] sm:$0xff]   ;;  %v702_v30 = vld [vmem:[#allocation4] sm:$0xff]   ;;  %v703_v54 = vld [vmem:[#allocation6 + $0x38] sm:$0xff]  }
  0x2e   :  { %597 = vmatpush3.bf16.msra.mxu0 %v684_v5  ;;  %v539_v32 = vld [vmem:[%s910_s2] ss:$0 sm:$0xff]  ;;  %v704_v55 = vld [vmem:[#allocation6 + $0x30] sm:$0xff]   ;;  %v705_v56 = vld [vmem:[#allocation6 + $0x28] sm:$0xff]  }
  0x2f   :  { %598 = vmatprep.subr.bf16.mxu0 %v685_v6  ;;  %v706_v57 = vld [vmem:[#allocation6 + $0x20] sm:$0xff]   ;;  %v707_v58 = vld [vmem:[#allocation6 + $0x18] sm:$0xff]   ;;  %v708_v59 = vld [vmem:[#allocation6 + $0x10] sm:$0xff]  }
  0x30   :  { %635 = vmatpush3.bf16.msra.mxu1 %v696_v24  ;;  %v709_v60 = vld [vmem:[#allocation6 + $0x8] sm:$0xff]   ;;  %v710_v61 = vld [vmem:[#allocation6] sm:$0xff]  }
  0x31   :  { %636 = vmatprep.subr.bf16.mxu1 %v796_v23  ;;  %v558_v62 = vld [vmem:[%s912_s4] ss:$0 sm:$0xff] }
  0x32   :  { %599 = vmatpush3.bf16.msra.mxu0 %v686_v7  ;;  %v569_v19 = vld [vmem:[%s914_s6] ss:$0 sm:$0xff] }
  0x33   :  { %600 = vmatprep.subr.bf16.mxu0 %v687_v8 }
  0x34   :  { %637 = vmatpush3.bf16.msra.mxu1 %v697_v25 }
  0x35   :  { %638 = vmatprep.subr.bf16.mxu1 %v796_v23 }
  0x36   :  { %601 = vmatpush3.bf16.msra.mxu0 %v688_v9 }
  0x37   :  { %602 = vmatprep.subr.bf16.mxu0 %v689_v10 }
  0x38   :  { %639 = vmatpush3.bf16.msra.mxu1 %v698_v26 }
  0x39   :  { %640 = vmatprep.subr.bf16.mxu1 %v796_v23 }
  0x3a   :  { %603 = vmatpush3.bf16.msra.mxu0 %v690_v13 }
  0x3b   :  { %604 = vmatprep.subr.bf16.mxu0 %v691_v15 }
  0x3c   :  { %641 = vmatpush3.bf16.msra.mxu1 %v699_v27 }
  0x3d   :  { %642 = vmatprep.subr.bf16.mxu1 %v796_v23 }
  0x3e   :  { %605 = vmatpush3.bf16.msra.mxu0 %v692_v16 }
  0x3f   :  { %606 = vmatprep.subr.bf16.mxu0 %v693_v17 }
  0x40   :  { %643 = vmatpush3.bf16.msra.mxu1 %v700_v28 }
  0x41   :  { %644 = vmatprep.subr.bf16.mxu1 %v796_v23 }
  0x42   :  { %607 = vmatpush3.bf16.msra.mxu0 %v694_v18 }
  0x43   :  { %652 = vmatprep.subr.bf16.mxu0 %v796_v23 }
  0x44   :  { %645 = vmatpush3.bf16.msra.mxu1 %v701_v29 }
  0x45   :  { %245 = vmatmul.mubr.bf16.vlgmr.msra.gmra.mxu0 %v75_v21  ;;  %646 = vmatprep.subr.bf16.mxu1 %v796_v23 }
  0x46   :  { %668 = vmatprep.mubr.msk.bf16.mxu0 %vm797_vm0, %v796_v23  ;;  %653 = vmatpush3.bf16.msra.mxu0 %v703_v54 }
  0x47   :  { %654 = vmatprep.subr.bf16.mxu0 %v796_v23 }
  0x48   :  { %647 = vmatpush3.bf16.msra.mxu1 %v702_v30 }
  0x4a   :  { %655 = vmatpush3.bf16.msra.mxu0 %v704_v55 }
  0x4b   :  { %656 = vmatprep.subr.bf16.mxu0 %v796_v23 }
  0x4e   :  { %657 = vmatpush3.bf16.msra.mxu0 %v705_v56 }
  0x4f   :  { %658 = vmatprep.subr.bf16.mxu0 %v796_v23 }
  0x52   :  { %659 = vmatpush3.bf16.msra.mxu0 %v706_v57 }
  0x53   :  { %660 = vmatprep.subr.bf16.mxu0 %v796_v23 }
  0x56   :  { %661 = vmatpush3.bf16.msra.mxu0 %v707_v58 }
  0x57   :  { %662 = vmatprep.subr.bf16.mxu0 %v796_v23 }
  0x5a   :  { %663 = vmatpush3.bf16.msra.mxu0 %v708_v59 }
  0x5b   :  { %664 = vmatprep.subr.bf16.mxu0 %v796_v23 }
  0x5e   :  { %665 = vmatpush3.bf16.msra.mxu0 %v709_v60 }
  0x5f   :  { %666 = vmatprep.subr.bf16.mxu0 %v796_v23 }
  0x62   :  { %667 = vmatpush3.bf16.msra.mxu0 %v710_v61 }
 0x105   :  { %v608_v31 = vpop.f32.mrf.mxu0 }
 0x107   :  { %v609_v33 = vpop.f32.mrf.mxu0 }
 0x108   :  { %v610_v34 = vadd.f32 %v609_v33, %v608_v31 }
 0x109   :  { %v611_v35 = vpop.f32.mrf.mxu0 }
 0x10a   :  { %v247_v36 = vadd.f32 %v610_v34, %v539_v32 }
 0x10b   :  { %v612_v37 = vpop.f32.mrf.mxu0 }
 0x10c   :  { %v263_v38 = vsub.f32 0.0, %v247_v36  ;;  %v613_v39 = vadd.f32 %v612_v37, %v611_v35 }
 0x10e   :  { %v265_v40 = vmul.f32 1.442695, %v263_v38  ;;  %v250_v41 = vadd.f32 %v613_v39, %v539_v32 }
 0x110   :  { %711 = vpow2.f32 %v265_v40  ;;  %v585_v42 = vpack.c.bf16 %v250_v41, %v247_v36  ;;  %v264_v43 = vsub.f32 0.0, %v250_v41 }
 0x112   :  { %586 = vst [vmem:[%s915_s7] sm:$0xff] %v585_v42   ;;  %v267_v44 = vmul.f32 1.442695, %v264_v43 }
 0x114   :  { %713 = vpow2.f32 %v267_v44 }
 0x11d   :  { %v712_v45 = vpop.eup %711 }
 0x11e   :  { %v269_v46 = vadd.f32 1.0, %v712_v45 }
 0x120   :  { %715 = vrcp.f32 %v269_v46 }
 0x121   :  { %v714_v47 = vpop.eup %713 }
 0x122   :  { %v270_v48 = vadd.f32 1.0, %v714_v47 }
 0x124   :  { %717 = vrcp.f32 %v270_v48 }
 0x12d   :  { %v716_v49 = vpop.eup %715 }
 0x12e   :  { %v273_v51 = vmul.f32 %v716_v49, %v247_v36 }
 0x131   :  { %v718_v50 = vpop.eup %717 }
 0x132   :  { %v274_v52 = vmul.f32 %v718_v50, %v250_v41 }
 0x134   :  { %v275_v53 = vpack.c.bf16 %v274_v52, %v273_v51 }
 0x136   :  { %649 = vmatmul.mubr.bf16.vlgmr.msra.gmra.mxu1 %v275_v53 }
 0x1f6   :  { %v381_v63 = vpop.f32.mrf.mxu1 }
 0x1f7   :  { %v382_v0 = vadd.f32 %v558_v62, %v381_v63 }
 0x1f8   :  { %v650_v1 = vpop.f32.mrf.mxu1 }
 0x1f9   :  { %v398_v2 = vsub.f32 0.0, %v382_v0 }
 0x1fa   :  { %v384_v3 = vpop.f32.mrf.mxu1 }
 0x1fb   :  { %v400_v4 = vmul.f32 1.442695, %v398_v2  ;;  %v385_v5 = vadd.f32 %v558_v62, %v384_v3 }
 0x1fc   :  { %v651_v6 = vpop.f32.mrf.mxu1 }
 0x1fd   :  { %719 = vpow2.f32 %v400_v4  ;;  %v590_v7 = vpack.c.bf16 %v385_v5, %v382_v0  ;;  %v399_v8 = vsub.f32 0.0, %v385_v5 }
 0x1ff   :  { %591 = vst [vmem:[%s916_s8] sm:$0xff] %v590_v7   ;;  %v402_v9 = vmul.f32 1.442695, %v399_v8 }
 0x201   :  { %721 = vpow2.f32 %v402_v9 }
 0x20a   :  { %v720_v10 = vpop.eup %719 }
 0x20b   :  { %v404_v11 = vadd.f32 1.0, %v720_v10 }
 0x20d   :  { %723 = vrcp.f32 %v404_v11 }
 0x20e   :  { %v722_v12 = vpop.eup %721 }
 0x20f   :  { %v405_v13 = vadd.f32 1.0, %v722_v12 }
 0x211   :  { %725 = vrcp.f32 %v405_v13 }
 0x21a   :  { %v724_v14 = vpop.eup %723 }
 0x21b   :  { %v408_v16 = vmul.f32 %v724_v14, %v382_v0 }
 0x21e   :  { %v726_v15 = vpop.eup %725 }
 0x21f   :  { %v409_v17 = vmul.f32 %v726_v15, %v385_v5 }
 0x221   :  { %v410_v18 = vpack.c.bf16 %v409_v17, %v408_v16 }
 0x223   :  { %669 = vmatmul.mubr.bf16.vlgmr.msra.gmra.mxu0 %v410_v18 }
 0x2e3   :  { %v516_v20 = vpop.f32.mrf.mxu0 }
 0x2e4   :  { %v517_v21 = vadd.f32 %v569_v19, %v516_v20 }
 0x2e5   :  { %v670_v22 = vpop.f32.mrf.mxu0 }
 0x2e6   :  { %523 = vst [vmem:[%s917_s9] sm:$0xff] %v517_v21 }
 0x2e7   :  { %v519_v23 = vpop.f32.mrf.mxu0 }
 0x2e8   :  { %v520_v24 = vadd.f32 %v569_v19, %v519_v23 }
 0x2e9   :  { %v671_v25 = vpop.f32.mrf.mxu0 }
 0x2ea   :  { %524 = vst [vmem:[%s917_s9 + $0x8] sm:$0xff] %v520_v24 }
 0x2eb   :  { %537 = vsyncpa [#allocation3], 1 }
 0x2ec   :  { %538 = vsyncpa [#allocation5], 1 }

</bundles_post_ra>
